<compile_context>
chip_gen: v5e
topology: v5e:2x2
jax: 0.10.0
libtpu: 0.0.40
codegen_flags: <defaults>
</compile_context>

<pallas_src>
import jax
import jax.numpy as jnp
from jax.experimental import pallas as pl
from jax.experimental.pallas import tpu as pltpu

IN_FEATURES = 768
NUM_LABELS = 2
NEG_SLOPE = 0.01     # nn.LeakyReLU default


def _device_caps():
    """(max batch-tile rows, min grid steps) for the current TPU generation."""
    try:
        kind = jax.devices()[0].device_kind.lower()
    except Exception:
        kind = ""
    if "v7" in kind:
        return 2048, 2       # 3.2 TB/s HBM, 2 TCs/chip, 32 MiB default scoped VMEM
    if "v6" in kind:
        return 2048, 1       # ~14 MiB double-buffered, well under 32 MiB default
    if "v5e" in kind or "v5 lite" in kind or "v5lite" in kind:
        return 1024, 1       # stays under v5e's 16 MiB default scoped VMEM
    return 1024, 1           # conservative default (v4/v5p/unknown)


_MAX_TB, _MIN_STEPS = _device_caps()


def _round8(n):
    return -(-n // 8) * 8


def _choose_tiling(batch):
    """Balanced batch tiling: tile count first, then near-equal 8-aligned tiles."""
    ntiles = max(_MIN_STEPS, pl.cdiv(batch, _MAX_TB))
    tb = _round8(pl.cdiv(batch, ntiles))
    if tb >= batch:
        # Single block covering the whole batch: block dim == full array dim,
        # legal for any batch size and avoids a partial block entirely.
        return batch, 1
    return tb, pl.cdiv(batch, tb)


def dc_kernel(x_ref, w_ref, b_ref, o_ref):
    # x_ref: (TB, 768)  w_ref: (2, 768)  b_ref: (1, 2)  o_ref: (TB, 2)
    # NT contraction (x @ w^T) so the weight stays in its compact (2, 768)
    # layout (lane-pads to (8, 768) = 24 KiB instead of (768, 128) = 384 KiB).
    y = jax.lax.dot_general(
        x_ref[...], w_ref[...],
        dimension_numbers=(((1,), (1,)), ((), ())),
        preferred_element_type=jnp.float32)
    y = y + b_ref[...]
    o_ref[...] = jnp.where(y >= 0.0, y, NEG_SLOPE * y).astype(o_ref.dtype)


def prepare_params(w3, b3):
    """Hoist parameter layout prep out of the per-call path.

    w3: [2, 768] (PyTorch nn.Linear layout), b3: [2]
    returns (w: [2, 768] f32, b_row: [1, 2] f32), kernel-ready (no transpose).
    """
    w = jnp.asarray(w3, jnp.float32)
    b_row = jnp.asarray(b3, jnp.float32).reshape(1, NUM_LABELS)
    return w, b_row


@jax.jit
def domain_classifier1_forward(x, w, b_row):
    """x: [B, 768] (f32 or bf16), w: [2, 768], b_row: [1, 2]  ->  [B, 2] f32."""
    B = x.shape[0]
    tb, grid = _choose_tiling(B)
    if w.dtype != x.dtype:
        # bf16 streaming path: cast the tiny weight to match x; the MXU still
        # accumulates in f32 via preferred_element_type.
        w = w.astype(x.dtype)

    return pl.pallas_call(
        dc_kernel,
        out_shape=jax.ShapeDtypeStruct((B, NUM_LABELS), jnp.float32),
        grid_spec=pltpu.PrefetchScalarGridSpec(
            num_scalar_prefetch=0,
            grid=(grid,),
            in_specs=[
                pl.BlockSpec((tb, IN_FEATURES), lambda i: (i, 0)),
                pl.BlockSpec((NUM_LABELS, IN_FEATURES), lambda i: (0, 0)),
                pl.BlockSpec((1, NUM_LABELS), lambda i: (0, 0)),
            ],
            out_specs=pl.BlockSpec((tb, NUM_LABELS), lambda i: (i, 0)),
        ),
        compiler_params=pltpu.CompilerParams(
            dimension_semantics=("parallel",)),
    )(x, w, b_row)


def _reference(x, w3, b3):
    y = x.astype(jnp.float32) @ w3.T + b3
    return jnp.where(y >= 0.0, y, NEG_SLOPE * y)


if __name__ == "__main__":
    key = jax.random.PRNGKey(0)
    kx, kw, kb = jax.random.split(key, 3)

    B = 16
    x = jax.random.normal(kx, (B, IN_FEATURES), jnp.float32)

    # Deterministic PyTorch-style Linear init: U(-1/sqrt(fan_in), 1/sqrt(fan_in))
    bound = 1.0 / (IN_FEATURES ** 0.5)
    w3 = jax.random.uniform(kw, (NUM_LABELS, IN_FEATURES), jnp.float32,
                            minval=-bound, maxval=bound)
    b3 = jax.random.uniform(kb, (NUM_LABELS,), jnp.float32,
                            minval=-bound, maxval=bound)

    # TODO(synk): dropout (p=0.1) is identity in eval mode; training-mode RNG
    # masking (pltpu.prng_seed / prng_random_bits) is intentionally not implemented.
    # linear1 / linear2 are dead code in the original forward and are omitted.

    w, b_row = prepare_params(w3, b3)   # hoisted out of the per-call path

    out = jax.block_until_ready(domain_classifier1_forward(x, w, b_row))
    ref = _reference(x, w3, b3)
    assert out.shape == (B, NUM_LABELS)
    assert jnp.allclose(out, ref, atol=1e-5, rtol=1e-5)

    # Ragged batch (not a multiple of 8) — exercises the no-pad tiling path.
    B2 = 20
    x2 = jax.random.normal(kx, (B2, IN_FEATURES), jnp.float32)
    out2 = jax.block_until_ready(domain_classifier1_forward(x2, w, b_row))
    assert out2.shape == (B2, NUM_LABELS)
    assert jnp.allclose(out2, _reference(x2, w3, b3), atol=1e-5, rtol=1e-5)

    print("KERNEL_OK")
</pallas_src>

<mosaic_0001>
module attributes {stable_mosaic.version = 11 : i64} {
  func.func @dc_kernel(%arg0: i32, %arg1: memref<16x768xf32, #tpu.memory_space<vmem>>, %arg2: memref<2x768xf32, #tpu.memory_space<vmem>>, %arg3: memref<1x2xf32, #tpu.memory_space<vmem>>, %arg4: memref<16x2xf32, #tpu.memory_space<vmem>>) attributes {dimension_semantics = [#tpu.dimension_semantics<parallel>], iteration_bounds = array<i64: 1>, scalar_prefetch = 0 : i64, scratch_operands = 0 : i64, tpu.core_type = #tpu.core_type<tc>, window_params = [{transform_indices = @transform_0, window_bounds = array<i64: 16, 768>}, {pipeline_mode = #tpu.pipeline_mode<synchronous>, transform_indices = @transform_1, window_bounds = array<i64: 2, 768>}, {pipeline_mode = #tpu.pipeline_mode<synchronous>, transform_indices = @transform_2, window_bounds = array<i64: 1, 2>}, {transform_indices = @transform_3, window_bounds = array<i64: 16, 2>}]} {
    %c0 = arith.constant 0 : index
    %c0_0 = arith.constant 0 : index
    %0 = vector.load %arg1[%c0, %c0_0] : memref<16x768xf32, #tpu.memory_space<vmem>>, vector<16x768xf32>
    %c0_1 = arith.constant 0 : index
    %c0_2 = arith.constant 0 : index
    %1 = vector.load %arg2[%c0_1, %c0_2] : memref<2x768xf32, #tpu.memory_space<vmem>>, vector<2x768xf32>
    %cst = arith.constant dense<0.000000e+00> : vector<16x2xf32>
    %2 = tpu.matmul %0, %1, %cst {dimension_numbers = #tpu.dot_dimension_numbers<[1], [1], [0], [0], [0, 0, 1, 0], [], []>} : vector<16x768xf32>, vector<2x768xf32>, vector<16x2xf32> -> vector<16x2xf32>
    %c0_3 = arith.constant 0 : index
    %c0_4 = arith.constant 0 : index
    %3 = vector.load %arg3[%c0_3, %c0_4] : memref<1x2xf32, #tpu.memory_space<vmem>>, vector<1x2xf32>
    %4 = vector.broadcast %3 : vector<1x2xf32> to vector<16x2xf32>
    %5 = arith.addf %2, %4 : vector<16x2xf32>
    %cst_5 = arith.constant 0.000000e+00 : f32
    %6 = vector.broadcast %cst_5 : f32 to vector<16x2xf32>
    %7 = arith.cmpf oge, %5, %6 : vector<16x2xf32>
    %cst_6 = arith.constant 0.00999999977 : f32
    %8 = vector.broadcast %cst_6 : f32 to vector<16x2xf32>
    %9 = arith.mulf %8, %5 : vector<16x2xf32>
    %10 = arith.select %7, %5, %9 : vector<16x2xi1>, vector<16x2xf32>
    %c0_7 = arith.constant 0 : index
    %c0_8 = arith.constant 0 : index
    %11 = vector.load %arg4[%c0_7, %c0_8] : memref<16x2xf32, #tpu.memory_space<vmem>>, vector<16x2xf32>
    tpu.vector_store %arg4[%c0_7, %c0_8], %10 {strides = array<i32>} : memref<16x2xf32, #tpu.memory_space<vmem>>, vector<16x2xf32>,
    return
  }
  func.func @transform_0(%arg0: i32) -> (i32, i32) {
    %c0_i32 = arith.constant 0 : i32
    %c0_i32_0 = arith.constant 0 : i32
    return %arg0, %c0_i32 : i32, i32
  }
  func.func @transform_1(%arg0: i32) -> (i32, i32) {
    %c0_i32 = arith.constant 0 : i32
    %c0_i32_0 = arith.constant 0 : i32
    %c0_i32_1 = arith.constant 0 : i32
    return %c0_i32, %c0_i32_0 : i32, i32
  }
  func.func @transform_2(%arg0: i32) -> (i32, i32) {
    %c0_i32 = arith.constant 0 : i32
    %c0_i32_0 = arith.constant 0 : i32
    %c0_i32_1 = arith.constant 0 : i32
    return %c0_i32, %c0_i32_0 : i32, i32
  }
  func.func @transform_3(%arg0: i32) -> (i32, i32) {
    %c0_i32 = arith.constant 0 : i32
    %c0_i32_0 = arith.constant 0 : i32
    return %arg0, %c0_i32 : i32, i32
  }
}

</mosaic_0001>

<bundles_post_ra>
// kernel: domain_classifier1_forward.1
= control target key start
LH: loop header
LB: loop body
LE: loop exit
PB: predicated region body
PF: predicated region fallthrough
CT: control target
= control target key end

     0   :  { %8 = vsyncpa [#allocation3], 0  ;;  %s330_s0 = inlined_call_operand.hbm [shape: f32[16,768], index: 0, kind: input, shape index: {}]   ;;  %s331_s1 = inlined_call_operand.hbm [shape: f32[2,768], index: 1, kind: input, shape index: {}]   ;;  %s332_s2 = inlined_call_operand.vmem [shape: f32[1,2], index: 2, kind: input, shape index: {}]   ;;  %s333_s3 = inlined_call_operand.vmem [shape: f32[16,2], index: 3, kind: output, shape index: {}]  }
   0x1   :  { %s14_s14 = sshll.u32 %s330_s0, 4  ;;  %s15_s14 = int_to_ptr.hbm [resolvable:$true] %s14_s14 }
   0x2   :  { %9 = vsyncpa [#allocation5], 0  ;;  %s291_s15 = smov [#allocation2]   ;;  %s28_s19 = sshll.u32 %s331_s1, 4  ;;  %s29_s19 = int_to_ptr.hbm [resolvable:$true] %s28_s19 }
   0x3   :  { %s16_s16 = sshll.u32 %s291_s15, 4  ;;  %s292_s20 = smov 768   ;;  %s17_s16 = int_to_ptr.vmem [resolvable:$true] %s16_s16 }
   0x4   :  { %s293_s21 = smov 48   ;;  %s294_s22 = smov [#allocation4]  }
   0x5   :  { %22 = dma.hbm_to_vmem [thread:$0]  %s15_s14, 1536, %s17_s16, [#allocation3], %s292_s20, %s292_s20, %s293_s21  }
   0x6   :  { %s30_s23 = sshll.u32 %s294_s22, 4  ;;  %s31_s23 = int_to_ptr.vmem [resolvable:$true] %s30_s23 }
   0x7   :  { %33 = dma.hbm_to_vmem [thread:$0]  %s29_s19, 192, %s31_s23, [#allocation5]  }
   0x8   :  { %287 = dma.done.wait [#allocation3], 1536  }
   0x9   :  { %288 = vsyncadd [#allocation3], 4294965760 }
   0xa   :  { %289 = dma.done.wait [#allocation5], 192  }
   0xb   :  { %290 = vsyncadd [#allocation5], 4294967104  ;;  %v56_v0 = vld [vmem:[#allocation4] sm:$0xff]  ;;  %v57_v1 = vld [vmem:[#allocation4 + $0x8] sm:$0xf]  ;;  %vm223_vm1 = vcmask 15360  }
   0xc   :  { %64 = vst [vmem:[#allocation1] ss:$4 sm:$0xff] %v56_v0  ;;  %v50_v2 = vld [vmem:[#allocation2 + $0x30] sm:$0xff]  ;;  %v51_v3 = vld [vmem:[#allocation2 + $0x38] sm:$0xff]  ;;  %v44_v10 = vld [vmem:[#allocation2] sm:$0xff] }
   0xd   :  { %66 = vst [vmem:[#allocation1 + $0x20] ss:$4 sm:$0xff] %v57_v1  ;;  %v45_v11 = vld [vmem:[#allocation2 + $0x8] sm:$0xff]  ;;  %v46_v12 = vld [vmem:[#allocation2 + $0x10] sm:$0xff]  ;;  %v47_v13 = vld [vmem:[#allocation2 + $0x18] sm:$0xff] }
   0xe   :  { %v48_v14 = vld [vmem:[#allocation2 + $0x20] sm:$0xff]  ;;  %v49_v15 = vld [vmem:[#allocation2 + $0x28] sm:$0xff]  ;;  %v54_v18 = vld [vmem:[#allocation2 + $0x50] sm:$0xff] }
   0xf   :  { %v52_v16 = vld [vmem:[#allocation2 + $0x40] sm:$0xff]  ;;  %v53_v17 = vld [vmem:[#allocation2 + $0x48] sm:$0xff]  ;;  %v55_v19 = vld [vmem:[#allocation2 + $0x58] sm:$0xff] }
  0x10   :  { %v238_v21 = vld [vmem:[%s332_s2] ss:$0 sm:$0xff] }
  0x13   :  { %v67_v4 = vld.sshfl [vmem:[#allocation1] sm:$0xff pattern:$0x73625140]  ;;  %v68_v5 = vld.sshfl [vmem:[#allocation1 + $0x8] sm:$0xff pattern:$0x73625140] }
  0x14   :  { %232 = vmatpush.xpose.msra.mxu2 %v67_v4  ;;  %233 = vmatpush.xpose.msra.mxu3 %v68_v5  ;;  %v69_v6 = vld.sshfl [vmem:[#allocation1 + $0x10] sm:$0xff pattern:$0x73625140]  ;;  %v70_v7 = vld.sshfl [vmem:[#allocation1 + $0x18] sm:$0xff pattern:$0x73625140] }
  0x15   :  { %v71_v8 = vld.sshfl [vmem:[#allocation1 + $0x20] sm:$0xff pattern:$0x73625140]  ;;  %v72_v9 = vld.sshfl [vmem:[#allocation1 + $0x28] sm:$0xff pattern:$0x73625140]  ;;  %94 = vmatpush.xpose.msra.mxu0 %v67_v4  ;;  %117 = vmatpush.xpose.msra.mxu1 %v68_v5 }
  0x17   :  { %98 = vmatmul.f32.vlgmr.msra.gmra.mxu2 %v50_v2  ;;  %121 = vmatmul.f32.vlgmr.msra.gmra.mxu3 %v51_v3 }
  0x18   :  { %140 = vmatpush.xpose.msrb.mxu2 %v69_v6  ;;  %163 = vmatpush.xpose.msrb.mxu3 %v70_v7 }
  0x19   :  { %186 = vmatpush.xpose.msrb.mxu0 %v71_v8  ;;  %209 = vmatpush.xpose.msrb.mxu1 %v72_v9 }
  0x1a   :  { %95 = vmatmul.f32.vlgmr.msra.gmra.mxu0 %v44_v10  ;;  %118 = vmatmul.f32.vlgmr.msra.gmra.mxu1 %v45_v11 }
  0x1f   :  { %141 = vmatmul.f32.vlgmr.msrb.gmra.mxu2 %v46_v12  ;;  %164 = vmatmul.f32.vlgmr.msrb.gmra.mxu3 %v47_v13 }
  0x22   :  { %187 = vmatmul.f32.vlgmr.msrb.gmra.mxu0 %v48_v14  ;;  %210 = vmatmul.f32.vlgmr.msrb.gmra.mxu1 %v49_v15 }
  0x27   :  { %144 = vmatmul.f32.gmra.mxu2 %v52_v16  ;;  %167 = vmatmul.f32.gmra.mxu3 %v53_v17 }
  0x2a   :  { %190 = vmatmul.f32.gmra.mxu0 %v54_v18  ;;  %213 = vmatmul.f32.gmra.mxu1 %v55_v19 }
  0x97   :  { %v96_v20 = vpop.f32.mrf.mxu0  ;;  %v119_v22 = vpop.f32.mrf.mxu1 }
  0x98   :  { %v97_v25 = vadd.f32 %v238_v21, %v96_v20 }
  0x9a   :  { %v99_v23 = vpop.f32.mrf.mxu2  ;;  %v122_v24 = vpop.f32.mrf.mxu3  ;;  %v120_v26 = vadd.f32 %v119_v22, %v97_v25 }
  0x9b   :  { %v100_v32 = vadd.f32 %v238_v21, %v99_v23 }
  0x9d   :  { %v123_v35 = vadd.f32 %v122_v24, %v100_v32 }
  0x9f   :  { %v188_v27 = vpop.f32.mrf.mxu0  ;;  %v211_v31 = vpop.f32.mrf.mxu1 }
  0xa2   :  { %v142_v28 = vpop.f32.mrf.mxu2  ;;  %v165_v29 = vpop.f32.mrf.mxu3 }
  0xa3   :  { %v143_v30 = vadd.f32 %v142_v28, %v120_v26 }
  0xa5   :  { %v166_v33 = vadd.f32 %v165_v29, %v143_v30 }
  0xa7   :  { %v189_v34 = vadd.f32 %v188_v27, %v166_v33  ;;  %v191_v41 = vpop.f32.mrf.mxu0  ;;  %v214_v44 = vpop.f32.mrf.mxu1 }
  0xa9   :  { %v212_v36 = vadd.f32 %v211_v31, %v189_v34 }
  0xaa   :  { %v145_v37 = vpop.f32.mrf.mxu2  ;;  %v168_v38 = vpop.f32.mrf.mxu3 }
  0xab   :  { %vm217_vm0 = vcmp.ge.f32.partialorder %v212_v36, 0.0  ;;  %v219_v39 = vmul.f32 0.01, %v212_v36  ;;  %v146_v40 = vadd.f32 %v145_v37, %v123_v35 }
  0xad   :  { %v221_v42 = vsel %vm217_vm0, %v212_v36, %v219_v39  ;;  %v169_v43 = vadd.f32 %v168_v38, %v146_v40 }
  0xae   :  { %224 = vst.msk [vmem:[%s333_s3] sm:$0xff] %vm223_vm1, %v221_v42 }
  0xaf   :  { %v192_v45 = vadd.f32 %v191_v41, %v169_v43 }
  0xb1   :  { %v215_v46 = vadd.f32 %v214_v44, %v192_v45 }
  0xb3   :  { %vm218_vm2 = vcmp.ge.f32.partialorder %v215_v46, 0.0  ;;  %v220_v47 = vmul.f32 0.01, %v215_v46 }
  0xb5   :  { %v222_v48 = vsel %vm218_vm2, %v215_v46, %v220_v47 }
  0xb6   :  { %225 = vst.msk [vmem:[%s333_s3 + $0x8] sm:$0xff] %vm223_vm1, %v222_v48 }
  0xb7   :  { %230 = vsyncpa [#allocation3], 1 }
  0xb8   :  { %231 = vsyncpa [#allocation5], 1 }

</bundles_post_ra>
